<compile_context>
chip_gen: v7x
topology: tpu7x:2x2x1
jax: 0.10.0
libtpu: 0.0.40
codegen_flags: <defaults>
</compile_context>

<pallas_src>
from functools import partial

import jax
import jax.numpy as jnp
from jax.experimental import pallas as pl
from jax.experimental.pallas import tpu as pltpu


# --------------------------------- kernels ----------------------------------

def _init_kernel(e_ref, loss_ref, a_ref, b_ref, *, quantiles, batch):
    """First call: fit (a, b) from e; emit lane-dense a/b and a per-tile scalar loss."""
    e = e_ref[...].astype(jnp.float32)                # (TB, Q+2, D), upcast after load
    tb, q2, _ = e.shape
    q1 = q2 - 1                                       # number of kept quantile rows (Q+1)
    qf = jnp.float32(quantiles)
    inv_q1 = jnp.float32(1.0 / q1)

    # Row index over the full (Q+2)-row layout. Row 0 is dropped;
    # row k (k >= 1) carries quantile coordinate x = (k-1)/Q - 0.5.
    k = jax.lax.broadcasted_iota(jnp.int32, (1, q2, 1), 1)
    keep = k >= 1                                     # (1, Q+2, 1)
    x = (k.astype(jnp.float32) - 1.0) / qf - 0.5      # (1, Q+2, 1)

    # b = mean over kept rows (sum of all rows minus row 0); a = telescoped Q*mean(diff).
    b = (jnp.sum(e, axis=1) - e[:, 0, :]) * inv_q1    # (TB, D)
    a = e[:, q2 - 1, :] - e[:, 1, :]                  # (TB, D)

    pred = a[:, None, :] * x + b[:, None, :]          # (TB, Q+2, D)
    sq = jnp.where(keep, (e - pred) ** 2, 0.0)
    loss_rd = jnp.sum(sq, axis=1) * inv_q1            # (TB, D)

    # Mask rows of a ragged last tile out of the in-kernel scalar reduction.
    row = pl.program_id(0) * tb + jax.lax.broadcasted_iota(jnp.int32, (tb, 1), 0)
    tile_loss = jnp.sum(jnp.where(row < batch, loss_rd, 0.0))

    loss_ref[...] = jnp.full((1, 8, 128), tile_loss, dtype=jnp.float32)
    a_ref[...] = a
    b_ref[...] = b


def _update_kernel(e_ref, a_in_ref, b_in_ref, loss_ref, a_ref, b_ref,
                   *, quantiles, lr, batch):
    """Later calls: one SGD step on (a, b); loss computed with the updated params."""
    e = e_ref[...].astype(jnp.float32)                # (TB, Q+2, D)
    a = a_in_ref[...]                                 # (TB, D) f32
    b = b_in_ref[...]                                 # (TB, D) f32
    tb, q2, _ = e.shape
    q1 = q2 - 1
    qf = jnp.float32(quantiles)
    inv_q1 = jnp.float32(1.0 / q1)
    two_lr = jnp.float32(2.0 * lr)

    k = jax.lax.broadcasted_iota(jnp.int32, (1, q2, 1), 1)
    keep = k >= 1
    x = (k.astype(jnp.float32) - 1.0) / qf - 0.5

    grad = jnp.where(keep, a[:, None, :] * x + b[:, None, :] - e, 0.0)
    b_new = b - two_lr * (jnp.sum(grad, axis=1) * inv_q1)
    a_new = a - two_lr * (jnp.sum(grad * x, axis=1) * inv_q1)

    pred = a_new[:, None, :] * x + b_new[:, None, :]
    sq = jnp.where(keep, (e - pred) ** 2, 0.0)
    loss_rd = jnp.sum(sq, axis=1) * inv_q1

    row = pl.program_id(0) * tb + jax.lax.broadcasted_iota(jnp.int32, (tb, 1), 0)
    tile_loss = jnp.sum(jnp.where(row < batch, loss_rd, 0.0))

    loss_ref[...] = jnp.full((1, 8, 128), tile_loss, dtype=jnp.float32)
    a_ref[...] = a_new
    b_ref[...] = b_new


# ------------------------------ tiling helpers -------------------------------

def _round_up(v, m):
    return ((v + m - 1) // m) * m


def _tpu_vmem_capacity():
    try:
        return int(pltpu.get_tpu_info().vmem_capacity_bytes)
    except Exception:
        return 64 * 1024 * 1024          # conservative (v7x-sized) fallback


def _per_row_vmem_bytes(q2, d, e_itemsize):
    """Honest per-batch-row VMEM footprint: sublane-padded input (double-buffered),
    f32 full-tile intermediates, and the small (TB, D) in/out blocks."""
    dp = _round_up(d, 128)
    sub = 32 // e_itemsize                            # f32 -> 8 sublanes, bf16 -> 16
    q2_in = _round_up(q2, sub)
    q2_f32 = _round_up(q2, 8)
    in_bytes = 2 * q2_in * dp * e_itemsize            # e3 block, double-buffered
    tmp_bytes = 3 * q2_f32 * dp * 4                   # f32 upcast + pred/grad/sq temps
    io_bytes = 2 * 6 * dp * 4                         # a/b in + a/b out (+ slack), x2 bufs
    return in_bytes + tmp_bytes + io_bytes


def _choose_block_b(batch, q2, d, e_itemsize):
    """Batch rows per grid step: biggest tile that honestly fits the VMEM budget,
    generation-aware, with >= 2 grid tiles (for v7x's 2 TCs) when B allows it."""
    capacity = _tpu_vmem_capacity()
    big_vmem = capacity >= 100 * 1024 * 1024          # v5e / v6e: 128 MiB physical
    budget = (24 if big_vmem else 10) * 1024 * 1024
    row_cap = 1024 if big_vmem else 512
    tb = budget // _per_row_vmem_bytes(q2, d, e_itemsize)
    tb = int(min(max(tb, 8), row_cap))
    if batch >= 16:
        tb = min(tb, _round_up(-(-batch // 2), 8))    # ceil(B/2) rounded up to 8
    if tb >= batch:
        return int(batch)                             # single full-batch tile
    return int(max(8, (tb // 8) * 8))                 # (TB, D) out blocks need TB % 8 == 0


def _vmem_limit_bytes(block_b, q2, d, e_itemsize):
    capacity = _tpu_vmem_capacity()
    need = block_b * _per_row_vmem_bytes(q2, d, e_itemsize) + (2 << 20)
    limit = max(2 * need, 32 * 1024 * 1024)
    return int(min(limit, capacity - (8 << 20), 100 * 1024 * 1024))


def _cost_estimate(B, Q2, D, e_itemsize, n_tiles, extra_bd_inputs):
    bytes_accessed = (B * Q2 * D * e_itemsize
                      + (2 + extra_bd_inputs) * B * D * 4
                      + n_tiles * 8 * 128 * 4)
    return pl.CostEstimate(flops=int(12 * B * Q2 * D), transcendentals=0,
                           bytes_accessed=int(bytes_accessed))


# --------------------------------- wrappers ---------------------------------

@partial(jax.jit, static_argnames=("quantiles", "block_b", "vmem_limit"))
def _init_forward(e3, *, quantiles, block_b, vmem_limit):
    B, Q2, D = e3.shape
    n_tiles = pl.cdiv(B, block_b)
    spec_bd = pl.BlockSpec((block_b, D), lambda i: (i, 0))
    loss_p, a, b = pl.pallas_call(
        partial(_init_kernel, quantiles=quantiles, batch=B),
        out_shape=(
            jax.ShapeDtypeStruct((n_tiles, 8, 128), jnp.float32),  # per-tile loss partial
            jax.ShapeDtypeStruct((B, D), jnp.float32),             # a
            jax.ShapeDtypeStruct((B, D), jnp.float32),             # b
        ),
        grid=(n_tiles,),
        in_specs=[pl.BlockSpec((block_b, Q2, D), lambda i: (i, 0, 0))],
        out_specs=(
            pl.BlockSpec((1, 8, 128), lambda i: (i, 0, 0)),
            spec_bd,
            spec_bd,
        ),
        compiler_params=pltpu.CompilerParams(
            dimension_semantics=("parallel",),
            vmem_limit_bytes=vmem_limit),
        cost_estimate=_cost_estimate(B, Q2, D, e3.dtype.itemsize, n_tiles, 0),
    )(e3)
    return jnp.sum(loss_p[:, 0, 0]), a, b


@partial(jax.jit, static_argnames=("quantiles", "lr", "block_b", "vmem_limit"))
def _update_forward(e3, a, b, *, quantiles, lr, block_b, vmem_limit):
    B, Q2, D = e3.shape
    n_tiles = pl.cdiv(B, block_b)
    spec_bd = pl.BlockSpec((block_b, D), lambda i: (i, 0))
    loss_p, a_new, b_new = pl.pallas_call(
        partial(_update_kernel, quantiles=quantiles, lr=lr, batch=B),
        out_shape=(
            jax.ShapeDtypeStruct((n_tiles, 8, 128), jnp.float32),
            jax.ShapeDtypeStruct((B, D), jnp.float32),
            jax.ShapeDtypeStruct((B, D), jnp.float32),
        ),
        grid=(n_tiles,),
        in_specs=[
            pl.BlockSpec((block_b, Q2, D), lambda i: (i, 0, 0)),
            spec_bd,
            spec_bd,
        ],
        out_specs=(
            pl.BlockSpec((1, 8, 128), lambda i: (i, 0, 0)),
            spec_bd,
            spec_bd,
        ),
        input_output_aliases={1: 1, 2: 2},            # donate a -> a_new, b -> b_new
        compiler_params=pltpu.CompilerParams(
            dimension_semantics=("parallel",),
            vmem_limit_bytes=vmem_limit),
        cost_estimate=_cost_estimate(B, Q2, D, e3.dtype.itemsize, n_tiles, 2),
    )(e3, a, b)
    return jnp.sum(loss_p[:, 0, 0]), a_new, b_new


class LazyLinearRegression:
    """JAX/Pallas port of beam.nn.model.LazyLinearRegression (stateful buffers a, b).
    Accepts f32 or bf16 activations e; internal math and a/b stay in f32."""

    def __init__(self, quantiles, lr=0.001, block_b=None):
        self.quantiles = quantiles
        self.lr = lr
        self.block_b = block_b
        self.a = None
        self.b = None

    def __call__(self, e):
        N, D = e.shape
        q2 = self.quantiles + 2
        if N % q2 != 0:
            raise ValueError(f"N={N} must be divisible by quantiles+2={q2}")
        B = N // q2
        # Free view; the first quantile row is dropped inside the kernel (no HBM copy).
        # The dtype is kept (bf16 activations are read as bf16; upcast happens in-kernel).
        e3 = e.reshape(B, q2, D)
        itemsize = e3.dtype.itemsize
        block_b = self.block_b if self.block_b is not None else _choose_block_b(
            B, q2, D, itemsize)
        vmem_limit = _vmem_limit_bytes(block_b, q2, D, itemsize)
        if self.b is None:
            loss, self.a, self.b = _init_forward(
                e3, quantiles=self.quantiles, block_b=block_b, vmem_limit=vmem_limit)
        else:
            loss, self.a, self.b = _update_forward(
                e3, self.a, self.b, quantiles=self.quantiles, lr=self.lr,
                block_b=block_b, vmem_limit=vmem_limit)
        return loss
        # TODO(synk): if production D < 128, pack a/b (and any per-row partials) into a
        # single lane-dense (B, k*128) output slab to avoid masked vst.msk stores.


class BeamEnsemble:
    """JAX port of beam.nn.model.BeamEnsemble over LazyLinearRegression members.
    Training: forward a single (indexed) member; eval: mean / stack over all members.
    The copy/reset/optimizer bookkeeping of the PyTorch class is host-side Python."""

    def __init__(self, net_factory, n_ensembles):
        self.ensembles = [net_factory() for _ in range(n_ensembles)]
        self.n_ensembles = n_ensembles
        self.training = True
        self.active_model = None
        self.net = None

    def __len__(self):
        return self.n_ensembles

    def train(self):
        self.training = True
        return self

    def eval(self):
        self.training = False
        return self

    def __call__(self, x, reduction="mean", index=None):
        if self.training:
            if index is None:
                index = 0  # deterministic default (PyTorch picks a random member)
            self.net = self.ensembles[index]
            self.active_model = index
            return self.net(x)
        self.net = None
        self.active_model = None
        ys = jnp.stack([net(x) for net in self.ensembles])
        if reduction == "mean":
            return ys.mean(axis=0)
        if reduction == "none":
            return ys
        raise NotImplementedError


# ---------------- pure-JAX reference (for correctness check) ----------------
def _ref_forward(e3f, quantiles, lr, a, b):
    ev = e3f[:, 1:]
    x = (jnp.arange(quantiles + 1, dtype=jnp.float32) / quantiles - 0.5).reshape(1, -1, 1)
    if b is None:
        b = ev.mean(axis=1)
        a = quantiles * jnp.diff(ev, axis=1).mean(axis=1)
    else:
        grad = a[:, None] * x + b[:, None] - ev
        b = b - 2 * lr * grad.mean(axis=1)
        a = a - 2 * lr * (grad * x).mean(axis=1)
    l = (ev - (a[:, None] * x + b[:, None])) ** 2
    return l.mean(axis=1).sum(), a, b


def _run_case(key, quantiles, batch, e_dim, dtype, lr=0.001, block_b=None):
    n = batch * (quantiles + 2)
    e = jax.random.normal(key, (n, e_dim), dtype=dtype)
    e3f = e.astype(jnp.float32).reshape(batch, quantiles + 2, e_dim)

    model = LazyLinearRegression(quantiles, lr=lr, block_b=block_b)
    loss1 = model(e)          # first call: fits a, b inside the kernel
    loss2 = model(e)          # second call: SGD step on a, b inside the kernel
    jax.block_until_ready((loss1, loss2, model.a, model.b))

    ref_loss1, ref_a1, ref_b1 = _ref_forward(e3f, quantiles, lr, None, None)
    ref_loss2, ref_a2, ref_b2 = _ref_forward(e3f, quantiles, lr, ref_a1, ref_b1)

    assert jnp.allclose(loss1, ref_loss1, rtol=1e-4, atol=1e-5), (loss1, ref_loss1)
    assert jnp.allclose(loss2, ref_loss2, rtol=1e-4, atol=1e-5), (loss2, ref_loss2)
    assert jnp.allclose(model.a, ref_a2, rtol=1e-4, atol=1e-5)
    assert jnp.allclose(model.b, ref_b2, rtol=1e-4, atol=1e-5)


if __name__ == "__main__":
    key = jax.random.PRNGKey(0)
    k1, k2, k3 = jax.random.split(key, 3)

    # f32 activations, single full-batch tile (B=2, D=32, Q2=10).
    _run_case(k1, quantiles=8, batch=2, e_dim=32, dtype=jnp.float32)
    # bf16 activations, multi-tile with a ragged last tile (B=12 over TB=8), D=128.
    _run_case(k2, quantiles=6, batch=12, e_dim=128, dtype=jnp.bfloat16, block_b=8)

    # BeamEnsemble wrapper: training forward (one member) and eval forward (mean).
    q, batch, d = 6, 4, 32
    e = jax.random.normal(k3, (batch * (q + 2), d), dtype=jnp.float32)
    ens = BeamEnsemble(lambda: LazyLinearRegression(q, lr=1e-3), n_ensembles=2)
    y_train = ens(e, index=0)
    ens.eval()
    y_eval = ens(e)
    jax.block_until_ready((y_train, y_eval))

    print("KERNEL_OK")
</pallas_src>

<mosaic_0001>
module attributes {stable_mosaic.version = 11 : i64} {
  func.func @_init_kernel(%arg0: i32, %arg1: memref<2x10x32xf32, #tpu.memory_space<vmem>>, %arg2: memref<1x8x128xf32, #tpu.memory_space<vmem>>, %arg3: memref<2x32xf32, #tpu.memory_space<vmem>>, %arg4: memref<2x32xf32, #tpu.memory_space<vmem>>) attributes {dimension_semantics = [#tpu.dimension_semantics<parallel>], iteration_bounds = array<i64: 1>, scalar_prefetch = 0 : i64, scratch_operands = 0 : i64, tpu.core_type = #tpu.core_type<tc>, window_params = [{transform_indices = @transform_0, window_bounds = array<i64: 2, 10, 32>}, {transform_indices = @transform_1, window_bounds = array<i64: 1, 8, 128>}, {transform_indices = @transform_2, window_bounds = array<i64: 2, 32>}, {transform_indices = @transform_3, window_bounds = array<i64: 2, 32>}]} {
    %c0 = arith.constant 0 : index
    %c0_0 = arith.constant 0 : index
    %c0_1 = arith.constant 0 : index
    %0 = vector.load %arg1[%c0, %c0_0, %c0_1] : memref<2x10x32xf32, #tpu.memory_space<vmem>>, vector<2x10x32xf32>
    %1 = tpu.iota {dimensions = array<i32: 1>} : vector<1x10x1xi32>
    %c1_i32 = arith.constant 1 : i32
    %2 = vector.broadcast %c1_i32 : i32 to vector<1x10x1xi32>
    %3 = arith.cmpi sge, %1, %2 : vector<1x10x1xi32>
    %4 = arith.sitofp %1 : vector<1x10x1xi32> to vector<1x10x1xf32>
    %cst = arith.constant 1.000000e+00 : f32
    %5 = vector.broadcast %cst : f32 to vector<1x10x1xf32>
    %6 = arith.subf %4, %5 : vector<1x10x1xf32>
    %cst_2 = arith.constant 8.000000e+00 : f32
    %7 = vector.broadcast %cst_2 : f32 to vector<1x10x1xf32>
    %8 = arith.divf %6, %7 : vector<1x10x1xf32>
    %cst_3 = arith.constant 5.000000e-01 : f32
    %9 = vector.broadcast %cst_3 : f32 to vector<1x10x1xf32>
    %10 = arith.subf %8, %9 : vector<1x10x1xf32>
    %cst_4 = arith.constant dense<0.000000e+00> : vector<2x32xf32>
    %11 = vector.multi_reduction <add>, %0, %cst_4 [1] : vector<2x10x32xf32> to vector<2x32xf32>
    %12 = vector.extract_strided_slice %0 {offsets = [0, 0, 0], sizes = [2, 1, 32], strides = [1, 1, 1]} : vector<2x10x32xf32> to vector<2x1x32xf32>
    %13 = vector.shape_cast %12 : vector<2x1x32xf32> to vector<2x32xf32>
    %14 = arith.subf %11, %13 : vector<2x32xf32>
    %cst_5 = arith.constant 0.111111112 : f32
    %15 = vector.broadcast %cst_5 : f32 to vector<2x32xf32>
    %16 = arith.mulf %14, %15 : vector<2x32xf32>
    %17 = vector.extract_strided_slice %0 {offsets = [0, 9, 0], sizes = [2, 1, 32], strides = [1, 1, 1]} : vector<2x10x32xf32> to vector<2x1x32xf32>
    %18 = vector.shape_cast %17 : vector<2x1x32xf32> to vector<2x32xf32>
    %19 = vector.extract_strided_slice %0 {offsets = [0, 1, 0], sizes = [2, 1, 32], strides = [1, 1, 1]} : vector<2x10x32xf32> to vector<2x1x32xf32>
    %20 = vector.shape_cast %19 : vector<2x1x32xf32> to vector<2x32xf32>
    %21 = arith.subf %18, %20 : vector<2x32xf32>
    %22 = vector.shape_cast %21 : vector<2x32xf32> to vector<2x1x32xf32>
    %23 = vector.broadcast %22 : vector<2x1x32xf32> to vector<2x10x32xf32>
    %24 = vector.broadcast %10 : vector<1x10x1xf32> to vector<2x10x32xf32>
    %25 = arith.mulf %23, %24 : vector<2x10x32xf32>
    %26 = vector.shape_cast %16 : vector<2x32xf32> to vector<2x1x32xf32>
    %27 = vector.broadcast %26 : vector<2x1x32xf32> to vector<2x10x32xf32>
    %28 = arith.addf %25, %27 : vector<2x10x32xf32>
    %29 = arith.subf %0, %28 : vector<2x10x32xf32>
    %30 = arith.mulf %29, %29 : vector<2x10x32xf32>
    %cst_6 = arith.constant 0.000000e+00 : f32
    %31 = vector.shape_cast %3 : vector<1x10x1xi1> to vector<1x10x1xi1>
    %32 = vector.broadcast %31 : vector<1x10x1xi1> to vector<2x10x32xi1>
    %33 = vector.broadcast %cst_6 : f32 to vector<2x10x32xf32>
    %34 = arith.select %32, %30, %33 : vector<2x10x32xi1>, vector<2x10x32xf32>
    %cst_7 = arith.constant dense<0.000000e+00> : vector<2x32xf32>
    %35 = vector.multi_reduction <add>, %34, %cst_7 [1] : vector<2x10x32xf32> to vector<2x32xf32>
    %cst_8 = arith.constant 0.111111112 : f32
    %36 = vector.broadcast %cst_8 : f32 to vector<2x32xf32>
    %37 = arith.mulf %35, %36 : vector<2x32xf32>
    %c2_i32 = arith.constant 2 : i32
    %38 = arith.muli %arg0, %c2_i32 : i32
    %39 = tpu.iota {dimensions = array<i32: 0>} : vector<2x1xi32>
    %40 = vector.broadcast %38 : i32 to vector<2x1xi32>
    %41 = arith.addi %40, %39 : vector<2x1xi32>
    %c2_i32_9 = arith.constant 2 : i32
    %42 = vector.broadcast %c2_i32_9 : i32 to vector<2x1xi32>
    %43 = arith.cmpi slt, %41, %42 : vector<2x1xi32>
    %cst_10 = arith.constant 0.000000e+00 : f32
    %44 = vector.shape_cast %43 : vector<2x1xi1> to vector<2x1xi1>
    %45 = vector.broadcast %44 : vector<2x1xi1> to vector<2x32xi1>
    %46 = vector.broadcast %cst_10 : f32 to vector<2x32xf32>
    %47 = arith.select %45, %37, %46 : vector<2x32xi1>, vector<2x32xf32>
    %48 = vector.shape_cast %47 : vector<2x32xf32> to vector<1x2x32xf32>
    %cst_11 = arith.constant dense<0.000000e+00> : vector<1xf32>
    %49 = vector.multi_reduction <add>, %48, %cst_11 [1, 2] : vector<1x2x32xf32> to vector<1xf32>
    %50 = vector.shape_cast %49 : vector<1xf32> to vector<1x1x1xf32>
    %51 = vector.extract %50[0, 0, 0] : f32 from vector<1x1x1xf32>
    %52 = vector.broadcast %51 : f32 to vector<1x8x128xf32>
    %c0_12 = arith.constant 0 : index
    %c0_13 = arith.constant 0 : index
    %c0_14 = arith.constant 0 : index
    %53 = vector.load %arg2[%c0_12, %c0_13, %c0_14] : memref<1x8x128xf32, #tpu.memory_space<vmem>>, vector<1x8x128xf32>
    tpu.vector_store %arg2[%c0_12, %c0_13, %c0_14], %52 {strides = array<i32>} : memref<1x8x128xf32, #tpu.memory_space<vmem>>, vector<1x8x128xf32>,
    %c0_15 = arith.constant 0 : index
    %c0_16 = arith.constant 0 : index
    %54 = vector.load %arg3[%c0_15, %c0_16] : memref<2x32xf32, #tpu.memory_space<vmem>>, vector<2x32xf32>
    tpu.vector_store %arg3[%c0_15, %c0_16], %21 {strides = array<i32>} : memref<2x32xf32, #tpu.memory_space<vmem>>, vector<2x32xf32>,
    %c0_17 = arith.constant 0 : index
    %c0_18 = arith.constant 0 : index
    %55 = vector.load %arg4[%c0_17, %c0_18] : memref<2x32xf32, #tpu.memory_space<vmem>>, vector<2x32xf32>
    tpu.vector_store %arg4[%c0_17, %c0_18], %16 {strides = array<i32>} : memref<2x32xf32, #tpu.memory_space<vmem>>, vector<2x32xf32>,
    return
  }
  func.func @transform_0(%arg0: i32) -> (i32, i32, i32) {
    %c0_i32 = arith.constant 0 : i32
    %c0_i32_0 = arith.constant 0 : i32
    %c0_i32_1 = arith.constant 0 : i32
    return %arg0, %c0_i32, %c0_i32_0 : i32, i32, i32
  }
  func.func @transform_1(%arg0: i32) -> (i32, i32, i32) {
    %c0_i32 = arith.constant 0 : i32
    %c0_i32_0 = arith.constant 0 : i32
    %c0_i32_1 = arith.constant 0 : i32
    return %arg0, %c0_i32, %c0_i32_0 : i32, i32, i32
  }
  func.func @transform_2(%arg0: i32) -> (i32, i32) {
    %c0_i32 = arith.constant 0 : i32
    %c0_i32_0 = arith.constant 0 : i32
    return %arg0, %c0_i32 : i32, i32
  }
  func.func @transform_3(%arg0: i32) -> (i32, i32) {
    %c0_i32 = arith.constant 0 : i32
    %c0_i32_0 = arith.constant 0 : i32
    return %arg0, %c0_i32 : i32, i32
  }
}

</mosaic_0001>

<bundles_post_ra>
// kernel: _init_forward.1
= control target key start
LH: loop header
LB: loop body
LE: loop exit
PB: predicated region body
PF: predicated region fallthrough
CT: control target
= control target key end

     0   :  { %9 = vsyncpa [#allocation3], 0  ;;  %v17_v3 = vlaneseq  ;;  %vm31_vm0 = vcmask 261120   ;;  %vm33_vm1 = vcmask 254976   ;;  %s330_s0 = inlined_call_operand.vmem [shape: f32[2,10,32], index: 0, kind: input, shape index: {}]   ;;  %s331_s1 = inlined_call_operand.vmem [shape: f32[1,8,128], index: 1, kind: output, shape index: {0}]   ;;  %s332_s2 = inlined_call_operand.hbm [shape: f32[2,32], index: 2, kind: output, shape index: {1}]   ;;  %s333_s3 = inlined_call_operand.hbm [shape: f32[2,32], index: 3, kind: output, shape index: {2}]  }
   0x1   :  { %v13_v0 = vld [vmem:[%s330_s0] sm:$0xff]  ;;  %v14_v1 = vld [vmem:[%s330_s0 + $0x8] sm:$0x3]  ;;  %v15_v2 = vld [vmem:[%s330_s0 + $0x10] sm:$0xff] }
   0x2   :  { %v16_v4 = vld [vmem:[%s330_s0 + $0x18] sm:$0x3]  ;;  %v32_v5 = vsel %vm31_vm0, %v13_v0, 0.0  ;;  %v34_v6 = vsel %vm33_vm1, %v14_v1, 0.0  ;;  %v42_v7 = vsel %vm31_vm0, %v15_v2, 0.0  ;;  %v280_v8 = vshrl.u32 %v17_v3, 7 }
   0x3   :  { %v35_v9 = vadd.f32 %v34_v6, %v32_v5  ;;  %v43_v10 = vsel %vm33_vm1, %v16_v4, 0.0 }
   0x4   :  { %10 = vsyncpa [#allocation5], 0  ;;  %v44_v11 = vadd.f32 %v43_v10, %v42_v7  ;;  %v19_v12 = vadd.s32 8, %v280_v8  ;;  %v22_v13 = vcvt.s32.f32 %v280_v8  ;;  %v285_v23 = vsub.f32 %v14_v1, %v13_v0  ;;  %s243_s0 = smov [#allocation2]   ;;  %s244_s21 = smov [#allocation4]  }
   0x5   :  { %v36_v14 = vrot.slane %v35_v9, 4  ;;  %v59_v27 = vsub.s32 1, %v280_v8  ;;  %v288_v29 = vsub.f32 %v16_v4, %v15_v2  ;;  %v71_v39 = vsub.s32 0, %v280_v8  ;;  %s163_s20 = sshll.u32 %s243_s0, 4  ;;  %s173_s22 = sshll.u32 %s244_s21, 4  ;;  %s164_s20 = int_to_ptr.vmem [resolvable:$true] %s163_s20  ;;  %s174_s22 = int_to_ptr.vmem [resolvable:$true] %s173_s22 }
   0x6   :  { %v45_v15 = vrot.slane %v44_v11, 4  ;;  %v23_v16 = vcvt.s32.f32 %v19_v12  ;;  %v187_v17 = vadd.f32 -1.0, %v22_v13  ;;  %vm20_vm2 = vcmp.ge.s32.totalorder %v280_v8, 1  ;;  %s195_s23 = scalar_lea.vmem %s164_s20, 32  ;;  %p200_p1 = scmp.lt.s32.totalorder %s164_s20, %s164_s20 }
   0x7   :  { %v37_v18 = vadd.f32 %v36_v14, %v35_v9  ;;  %v60_v35 = vrot.slane %v285_v23, %v59_v27  ;;  %v64_v37 = vrot.slane %v288_v29, %v59_v27  ;;  %vm125_vm3 = vcmask 1041409   ;;  %p196_p0 = scmp.ne.s32.totalorder %s164_s20, %s195_s23  ;;  %p201_p2 = scmp.lt.s32.totalorder %s195_s23, %s195_s23 }
   0x8   :  { %v46_v19 = vadd.f32 %v45_v15, %v44_v11  ;;  %v188_v20 = vadd.f32 -1.0, %v23_v16  ;;  %v27_v24 = vmul.f32 0.125, %v187_v17  ;;  %vm120_vm4 = vcmp.lt.s32.totalorder %v280_v8, 2 }
   0x9   :  { %v38_v21 = vrot.slane %v37_v18, 2  ;;  %vm144_vm5 = vcmask 1042434   ;;  %vm147_vm6 = vcmask 256001   ;;  %p202_p3 = por %p201_p2, %p200_p1 }
   0xa   :  { %v47_v22 = vrot.slane %v46_v19, 2  ;;  %v28_v25 = vmul.f32 0.125, %v188_v20  ;;  %v189_v32 = vadd.f32 -0.5, %v27_v24  ;;  %v143_v24 = vrot.slane %v288_v29, 7 }
   0xb   :  { %v39_v26 = vadd.f32 %v38_v21, %v37_v18  ;;  %p203_p4 = pnand %p202_p3, %p196_p0 }
   0xc   :  { %v48_v28 = vadd.f32 %v47_v22, %v46_v19  ;;  %v190_v33 = vadd.f32 -0.5, %v28_v25  ;;  %v65_v42 = vmul.f32 %v189_v32, %v60_v35  ;;  %v67_v45 = vmul.f32 %v189_v32, %v64_v37 }
   0xd   :  { %v40_v30 = vrot.slane %v39_v26, 1 }
   0xe   :  { %v49_v31 = vrot.slane %v48_v28, 1  ;;  %v66_v43 = vmul.f32 %v190_v33, %v60_v35  ;;  %v68_v46 = vmul.f32 %v190_v33, %v64_v37 }
   0xf   :  { %v41_v34 = vadd.f32 %v40_v30, %v39_v26  ;;  %v145_v26 = vsel %vm144_vm5, %v143_v24, %v285_v23 }
  0x10   :  { %v50_v36 = vadd.f32 %v49_v31, %v48_v28  ;;  %148 = vst.msk [vmem:[#allocation2 - $0x1] sm:$0x6] %vm147_vm6, %v145_v26 }
  0x11   :  { %v51_v38 = vsub.f32 %v41_v34, %v13_v0 }
  0x12   :  { %v52_v40 = vsub.f32 %v50_v36, %v15_v2 }
  0x13   :  { %v53_v41 = vmul.f32 0.11111111, %v51_v38 }
  0x14   :  { %v54_v44 = vmul.f32 0.11111111, %v52_v40 }
  0x15   :  { %v72_v47 = vrot.slane %v53_v41, %v71_v39 }
  0x16   :  { %v76_v48 = vrot.slane %v54_v44, %v71_v39  ;;  %v151_v25 = vrot.slane %v54_v44, 7 }
  0x17   :  { %v77_v49 = vadd.f32 %v72_v47, %v65_v42  ;;  %v78_v50 = vadd.f32 %v72_v47, %v66_v43 }
  0x18   :  { %v79_v51 = vadd.f32 %v76_v48, %v67_v45  ;;  %v80_v52 = vadd.f32 %v76_v48, %v68_v46  ;;  %v152_v27 = vsel %vm125_vm3, %v151_v25, %v53_v41 }
  0x19   :  { %v81_v53 = vsub.f32 %v13_v0, %v77_v49  ;;  %v82_v54 = vsub.f32 %v14_v1, %v78_v50  ;;  %154 = vst.msk [vmem:[#allocation4] sm:$0x3] %vm33_vm1, %v152_v27 }
  0x1a   :  { %v83_v55 = vsub.f32 %v15_v2, %v79_v51  ;;  %v84_v56 = vsub.f32 %v16_v4, %v80_v52 }
  0x1b   :  { %v85_v57 = vmul.f32 %v81_v53, %v81_v53  ;;  %v86_v58 = vmul.f32 %v82_v54, %v82_v54 }
  0x1c   :  { %v87_v59 = vmul.f32 %v83_v55, %v83_v55  ;;  %v88_v60 = vmul.f32 %v84_v56, %v84_v56 }
  0x1d   :  { %v93_v61 = vsel %vm20_vm2, %v85_v57, 0.0  ;;  %v98_v62 = vsel %vm33_vm1, %v86_v58, 0.0 }
  0x1e   :  { %v95_v63 = vsel %vm20_vm2, %v87_v59, 0.0  ;;  %v97_v3 = vsel %vm31_vm0, %v93_v61, 0.0  ;;  %v107_v5 = vsel %vm33_vm1, %v88_v60, 0.0 }
  0x1f   :  { %v99_v6 = vadd.f32 %v98_v62, %v97_v3  ;;  %v106_v0 = vsel %vm31_vm0, %v95_v63, 0.0 }
  0x20   :  { %v108_v1 = vadd.f32 %v107_v5, %v106_v0 }
  0x21   :  { %v100_v7 = vrot.slane %v99_v6, 4 }
  0x22   :  { %v109_v9 = vrot.slane %v108_v1, 4 }
  0x23   :  { %v101_v2 = vadd.f32 %v100_v7, %v99_v6 }
  0x24   :  { %v110_v4 = vadd.f32 %v109_v9, %v108_v1 }
  0x25   :  { %v102_v10 = vrot.slane %v101_v2, 2 }
  0x26   :  { %v111_v11 = vrot.slane %v110_v4, 2 }
  0x27   :  { %v103_v12 = vadd.f32 %v102_v10, %v101_v2 }
  0x28   :  { %v112_v13 = vadd.f32 %v111_v11, %v110_v4 }
  0x29   :  { %v104_v14 = vrot.slane %v103_v12, 1 }
  0x2a   :  { %v113_v15 = vrot.slane %v112_v13, 1 }
  0x2b   :  { %v105_v16 = vadd.f32 %v104_v14, %v103_v12 }
  0x2c   :  { %v114_v17 = vadd.f32 %v113_v15, %v112_v13 }
  0x2d   :  { %v115_v18 = vmul.f32 0.11111111, %v105_v16 }
  0x2e   :  { %v116_v19 = vmul.f32 0.11111111, %v114_v17 }
  0x30   :  { %v126_v20 = vsel %vm125_vm3, %v116_v19, %v115_v18 }
  0x31   :  { %v128_v21 = vsel %vm120_vm4, %v126_v20, 0.0 }
  0x32   :  { %v129_v22 = vsel %vm33_vm1, %v128_v21, 0.0 }
  0x33   :  { %130 = vadd.xlane.f32.xlu0 %v129_v22 }
  0x34   :  { %206 = shalt.err (!%p203_p4)
}
  0x35   :  { %s207_s26 = scalar_lea.hbm %s332_s2, 32 }
  0x36   :  { %p208_p5 = scmp.ne.s32.totalorder %s332_s2, %s207_s26  ;;  %p211_p6 = scmp.lt.u32.totalorder %s207_s26, %s332_s2 }
  0x38   :  { %p213_p7 = pnand %p211_p6, %p208_p5 }
  0x3a   :  { %216 = shalt.err (!%p213_p7)
}
  0x3b   :  { %166 = dma.vmem_to_hbm [thread:$0]  %s164_s20, 32, %s332_s2, [#allocation3]  }
  0x3c   :  { %s217_s6 = scalar_lea.vmem %s174_s22, 32  ;;  %p222_p9 = scmp.lt.s32.totalorder %s174_s22, %s174_s22 }
  0x3d   :  { %p218_p8 = scmp.ne.s32.totalorder %s174_s22, %s217_s6  ;;  %p223_p10 = scmp.lt.s32.totalorder %s217_s6, %s217_s6 }
  0x3f   :  { %p224_p11 = por %p223_p10, %p222_p9 }
  0x41   :  { %p225_p12 = pnand %p224_p11, %p218_p8 }
  0x43   :  { %228 = shalt.err (!%p225_p12)
}
  0x44   :  { %s229_s9 = scalar_lea.hbm %s333_s3, 32 }
  0x45   :  { %p230_p13 = scmp.ne.s32.totalorder %s333_s3, %s229_s9  ;;  %p233_p0 = scmp.lt.u32.totalorder %s229_s9, %s333_s3 }
  0x47   :  { %p235_p1 = pnand %p233_p0, %p230_p13 }
  0x49   :  { %238 = shalt.err (!%p235_p1)
}
  0x4a   :  { %176 = dma.vmem_to_hbm [thread:$0]  %s174_s22, 32, %s333_s3, [#allocation5]  }
  0xc0   :  { %v131_v8 = vpop.xlane.xlu0 %130 }
  0xc1   :  { %v132_v23 = vrot.slane %v131_v8, 4 }
  0xc3   :  { %v133_v28 = vadd.f32 %v132_v23, %v131_v8 }
  0xc5   :  { %v134_v29 = vrot.slane %v133_v28, 2 }
  0xc7   :  { %v135_v30 = vadd.f32 %v134_v29, %v133_v28 }
  0xc9   :  { %v136_v31 = vrot.slane %v135_v30, 1 }
  0xcb   :  { %v137_v32 = vadd.f32 %v136_v31, %v135_v30 }
  0xcd   :  { %191 = vpush %v137_v32 }
  0xfe   :  { %s192_s15 = spop %191 }
  0xff   :  { %v139_v33 = vstv %s192_s15 }
 0x100   :  { %140 = vst [vmem:[%s331_s1] sm:$0xff] %v139_v33 }
 0x101   :  { %239 = dma.done.wait [#allocation3], 32  }
 0x102   :  { %240 = vsyncadd [#allocation3], 4294967264 }
 0x103   :  { %241 = dma.done.wait [#allocation5], 32  }
 0x104   :  { %242 = vsyncadd [#allocation5], 4294967264 }
 0x105   :  { %185 = vsyncpa [#allocation3], 1 }
 0x106   :  { %186 = vsyncpa [#allocation5], 1 }

</bundles_post_ra>
